<compile_context>
chip_gen: v6e
topology: v6e:2x2x1
jax: 0.10.0
libtpu: 0.0.40
codegen_flags: <defaults>
</compile_context>

<pallas_src>
import jax
import jax.numpy as jnp
from jax import lax
from jax.experimental import pallas as pl
from jax.experimental.pallas import tpu as pltpu


def _make_shortcut_kernel(approximate_gelu: bool):
    def kernel(x_ref, ss_ref, w_ref, b_ref, o_ref):
        # x_ref:  (Cin, THW)    activation slab (channels on sublanes, spatial on lanes)
        # ss_ref: (2, Cin, 1)   [0] = BN scale = gamma/sqrt(var+eps), [1] = shift
        # w_ref:  (Cout, Cin)   1x1 conv weight, bf16
        # b_ref:  (Cout, 1)     conv bias, f32
        # o_ref:  (Cout, THW)   output slab (lane-dense)
        x = x_ref[...].astype(jnp.float32)

        scale = ss_ref[0]          # (Cin, 1) -> broadcasts along lanes
        shift = ss_ref[1]
        xn = x * scale + shift

        if approximate_gelu:
            # tanh-approx GELU: single EUP push instead of a VALU erf polynomial.
            c = 0.7978845608028654   # sqrt(2/pi)
            g = 0.5 * xn * (1.0 + jnp.tanh(c * (xn + 0.044715 * xn * xn * xn)))
        else:
            # Exact (erf-based) GELU, matching torch.nn.GELU default.
            inv_sqrt2 = 0.7071067811865476
            g = 0.5 * xn * (1.0 + lax.erf(xn * inv_sqrt2))

        # 1x1 conv == channel matmul on the MXU (bf16 operands, f32 accumulate).
        out = jnp.dot(w_ref[...], g.astype(jnp.bfloat16),
                      preferred_element_type=jnp.float32)
        out = out + b_ref[...]
        o_ref[...] = out.astype(o_ref.dtype)

    return kernel


def _round_up(x, m):
    return ((x + m - 1) // m) * m


def shortcut_forward(x_nchw, gamma, beta, run_mean, run_var, conv_w, conv_b,
                     eps=1e-5, tile_hw=None, approximate_gelu=False,
                     bf16_activations=False):
    """x_nchw: (N, C_in, H, W). conv_w: (C_out, C_in, 1, 1). Returns (N, C_out, H, W)."""
    N, Cin, H, W = x_nchw.shape
    Cout = conv_w.shape[0]
    HW = H * W
    LANE = 128

    # ---- generation-aware VMEM budget ----
    try:
        vmem_cap = int(pltpu.get_tpu_info().vmem_capacity_bytes)
    except Exception:
        vmem_cap = 128 * 1024 * 1024
    small_vmem = vmem_cap <= 64 * 1024 * 1024          # v7x-class (64 MiB / TC)
    vmem_budget = (28 if small_vmem else 48) * 1024 * 1024

    x_in_dtype = jnp.bfloat16 if bf16_activations else x_nchw.dtype
    x_itemsize = jnp.dtype(x_in_dtype).itemsize
    out_itemsize = jnp.dtype(x_nchw.dtype).itemsize

    # Resident parameters (double-buffered by the pipeline too): ss (f32),
    # weight (bf16), bias (f32).
    resident_bytes = 2 * (2 * Cin * 4 + Cout * Cin * 2 + Cout * 4)

    # ---- spatial tile selection: lane-dense multiples of 128, no host padding ----
    hw_ceil = _round_up(HW, LANE)
    target = int(tile_hw) if tile_hw is not None else (1024 if small_vmem else 2048)
    target = max(LANE, _round_up(target, LANE))

    # Fit double-buffered x + out tiles (plus resident params) in ~60% of the budget.
    per_col_bytes = 2 * (Cin * x_itemsize + Cout * out_itemsize)
    max_cols = (int(0.6 * vmem_budget) - resident_bytes) // max(per_col_bytes, 1)
    max_cols = max(LANE, (max_cols // LANE) * LANE)

    thw = min(target, hw_ceil, max_cols)
    # With a single image, make sure the spatial axis has >= 2 blocks so both
    # v7x TensorCores get work (harmless on single-TC chips).
    if N == 1 and HW > LANE:
        thw = min(thw, max(LANE, _round_up((HW + 1) // 2, LANE)))
    thw = max(LANE, (thw // LANE) * LANE)

    grid = (N, pl.cdiv(HW, thw))

    # NCHW -> (N, Cin, HW): reshape only, no transpose / pad / layout round trip.
    x3 = x_nchw.reshape(N, Cin, HW)
    if bf16_activations:
        x3 = x3.astype(jnp.bfloat16)

    # Fold BN (eval mode) into per-channel scale/shift, packed into one array.
    inv_std = 1.0 / jnp.sqrt(run_var.astype(jnp.float32) + eps)
    scale = gamma.astype(jnp.float32) * inv_std
    shift = beta.astype(jnp.float32) - run_mean.astype(jnp.float32) * scale
    ss = jnp.stack([scale, shift]).reshape(2, Cin, 1)                # (2, Cin, 1) f32

    w2d = conv_w.reshape(Cout, Cin).astype(jnp.bfloat16)             # (Cout, Cin) bf16
    b2d = conv_b.reshape(Cout, 1).astype(jnp.float32)                # (Cout, 1)  f32

    vmem_need = 2 * thw * (Cin * x_itemsize + Cout * out_itemsize) + resident_bytes
    vmem_limit = int(min(max(2 * vmem_need, 8 * 1024 * 1024), vmem_budget))

    cost = pl.CostEstimate(
        flops=2 * N * HW * Cin * Cout,
        transcendentals=N * HW * Cin,
        bytes_accessed=N * HW * (Cin * x_itemsize + Cout * out_itemsize)
        + Cout * Cin * 2,
    )

    out3 = pl.pallas_call(
        _make_shortcut_kernel(approximate_gelu),
        out_shape=jax.ShapeDtypeStruct((N, Cout, HW), x_nchw.dtype),
        grid_spec=pltpu.PrefetchScalarGridSpec(
            num_scalar_prefetch=0,
            grid=grid,
            in_specs=[
                pl.BlockSpec((None, Cin, thw), lambda n, j: (n, 0, j)),
                pl.BlockSpec((2, Cin, 1), lambda n, j: (0, 0, 0)),
                pl.BlockSpec((Cout, Cin), lambda n, j: (0, 0)),
                pl.BlockSpec((Cout, 1), lambda n, j: (0, 0)),
            ],
            out_specs=pl.BlockSpec((None, Cout, thw), lambda n, j: (n, 0, j)),
        ),
        compiler_params=pltpu.CompilerParams(
            dimension_semantics=("parallel", "parallel"),
            vmem_limit_bytes=vmem_limit,
        ),
        cost_estimate=cost,
    )(x3, ss, w2d, b2d)

    # Pure reshape back to NCHW (no slice, no transpose).
    return out3.reshape(N, Cout, H, W)


def _reference(x_nchw, gamma, beta, run_mean, run_var, conv_w, conv_b, eps=1e-5):
    """Matched-precision reference (f32 BN+GELU, bf16 matmul operands, f32 accumulate)."""
    x = x_nchw.astype(jnp.float32)
    scale = gamma / jnp.sqrt(run_var + eps)
    shift = beta - run_mean * scale
    xn = x * scale[None, :, None, None] + shift[None, :, None, None]
    g = 0.5 * xn * (1.0 + lax.erf(xn * 0.7071067811865476))
    Cout, Cin = conv_w.shape[0], conv_w.shape[1]
    w = conv_w.reshape(Cout, Cin).astype(jnp.bfloat16).astype(jnp.float32)
    gb = g.astype(jnp.bfloat16).astype(jnp.float32)
    out = jnp.einsum("nchw,oc->nohw", gb, w) + conv_b[None, :, None, None]
    return out.astype(x_nchw.dtype)


if __name__ == "__main__":
    key = jax.random.PRNGKey(0)
    k1, k2, k3, k4, k5, k6, k7 = jax.random.split(key, 7)

    N, Cin, H, W = 2, 4, 16, 16
    Cout = 8

    x = jax.random.normal(k1, (N, Cin, H, W), dtype=jnp.float32)

    # BatchNorm2d params (deterministic, non-trivial)
    gamma = 1.0 + 0.1 * jax.random.normal(k2, (Cin,), dtype=jnp.float32)
    beta = 0.1 * jax.random.normal(k3, (Cin,), dtype=jnp.float32)
    run_mean = 0.1 * jax.random.normal(k4, (Cin,), dtype=jnp.float32)
    run_var = 1.0 + 0.1 * jax.random.uniform(k5, (Cin,), dtype=jnp.float32)

    # Conv2d(in_channels, out_channels, kernel_size=1) params
    conv_w = 0.2 * jax.random.normal(k6, (Cout, Cin, 1, 1), dtype=jnp.float32)
    conv_b = 0.05 * jax.random.normal(k7, (Cout,), dtype=jnp.float32)

    out = shortcut_forward(x, gamma, beta, run_mean, run_var, conv_w, conv_b)
    out = jax.block_until_ready(out)

    ref = _reference(x, gamma, beta, run_mean, run_var, conv_w, conv_b)
    assert out.shape == (N, Cout, H, W)
    assert jnp.allclose(out, ref, atol=2e-3, rtol=2e-3)

    print("KERNEL_OK")
</pallas_src>

<mosaic_0001>
module attributes {stable_mosaic.version = 11 : i64} {
  func.func @kernel(%arg0: i32, %arg1: i32, %arg2: memref<1x4x256xf32, #tpu.memory_space<vmem>>, %arg3: memref<2x4x1xf32, #tpu.memory_space<vmem>>, %arg4: memref<8x4xbf16, #tpu.memory_space<vmem>>, %arg5: memref<8x1xf32, #tpu.memory_space<vmem>>, %arg6: memref<1x8x256xf32, #tpu.memory_space<vmem>>) attributes {dimension_semantics = [#tpu.dimension_semantics<parallel>, #tpu.dimension_semantics<parallel>], iteration_bounds = array<i64: 2, 1>, scalar_prefetch = 0 : i64, scratch_operands = 0 : i64, tpu.core_type = #tpu.core_type<tc>, window_params = [{transform_indices = @transform_0, window_bounds = array<i64: 1, 4, 256>}, {pipeline_mode = #tpu.pipeline_mode<synchronous>, transform_indices = @transform_1, window_bounds = array<i64: 2, 4, 1>}, {pipeline_mode = #tpu.pipeline_mode<synchronous>, transform_indices = @transform_2, window_bounds = array<i64: 8, 4>}, {pipeline_mode = #tpu.pipeline_mode<synchronous>, transform_indices = @transform_3, window_bounds = array<i64: 8, 1>}, {transform_indices = @transform_4, window_bounds = array<i64: 1, 8, 256>}]} {
    %c0 = arith.constant 0 : index
    %c0_0 = arith.constant 0 : index
    %c0_1 = arith.constant 0 : index
    %0 = vector.load %arg2[%c0, %c0_0, %c0_1] : memref<1x4x256xf32, #tpu.memory_space<vmem>>, vector<1x4x256xf32>
    %1 = vector.shape_cast %0 : vector<1x4x256xf32> to vector<4x256xf32>
    %c0_2 = arith.constant 0 : index
    %c0_3 = arith.constant 0 : index
    %c0_4 = arith.constant 0 : index
    %2 = vector.load %arg3[%c0_2, %c0_3, %c0_4] : memref<2x4x1xf32, #tpu.memory_space<vmem>>, vector<1x4x1xf32>
    %3 = vector.shape_cast %2 : vector<1x4x1xf32> to vector<4x1xf32>
    %c1 = arith.constant 1 : index
    %c0_5 = arith.constant 0 : index
    %c0_6 = arith.constant 0 : index
    %4 = vector.load %arg3[%c1, %c0_5, %c0_6] : memref<2x4x1xf32, #tpu.memory_space<vmem>>, vector<1x4x1xf32>
    %5 = vector.shape_cast %4 : vector<1x4x1xf32> to vector<4x1xf32>
    %6 = vector.broadcast %3 : vector<4x1xf32> to vector<4x256xf32>
    %7 = arith.mulf %1, %6 : vector<4x256xf32>
    %8 = vector.broadcast %5 : vector<4x1xf32> to vector<4x256xf32>
    %9 = arith.addf %7, %8 : vector<4x256xf32>
    %cst = arith.constant 5.000000e-01 : f32
    %10 = vector.broadcast %cst : f32 to vector<4x256xf32>
    %11 = arith.mulf %10, %9 : vector<4x256xf32>
    %cst_7 = arith.constant 0.707106769 : f32
    %12 = vector.broadcast %cst_7 : f32 to vector<4x256xf32>
    %13 = arith.mulf %9, %12 : vector<4x256xf32>
    %14 = math.erf %13 : vector<4x256xf32>
    %cst_8 = arith.constant 1.000000e+00 : f32
    %15 = vector.broadcast %cst_8 : f32 to vector<4x256xf32>
    %16 = arith.addf %15, %14 : vector<4x256xf32>
    %17 = arith.mulf %11, %16 : vector<4x256xf32>
    %c0_9 = arith.constant 0 : index
    %c0_10 = arith.constant 0 : index
    %18 = vector.load %arg4[%c0_9, %c0_10] : memref<8x4xbf16, #tpu.memory_space<vmem>>, vector<8x4xbf16>
    %19 = arith.truncf %17 : vector<4x256xf32> to vector<4x256xbf16>
    %cst_11 = arith.constant dense<0.000000e+00> : vector<8x256xf32>
    %20 = tpu.matmul %18, %19, %cst_11 {dimension_numbers = #tpu.dot_dimension_numbers<[1], [0], [0], [1], [0, 0, 1, 1], [], []>} : vector<8x4xbf16>, vector<4x256xbf16>, vector<8x256xf32> -> vector<8x256xf32>
    %c0_12 = arith.constant 0 : index
    %c0_13 = arith.constant 0 : index
    %21 = vector.load %arg5[%c0_12, %c0_13] : memref<8x1xf32, #tpu.memory_space<vmem>>, vector<8x1xf32>
    %22 = vector.broadcast %21 : vector<8x1xf32> to vector<8x256xf32>
    %23 = arith.addf %20, %22 : vector<8x256xf32>
    %c0_14 = arith.constant 0 : index
    %c0_15 = arith.constant 0 : index
    %c0_16 = arith.constant 0 : index
    %24 = vector.load %arg6[%c0_14, %c0_15, %c0_16] : memref<1x8x256xf32, #tpu.memory_space<vmem>>, vector<1x8x256xf32>
    %25 = vector.shape_cast %24 : vector<1x8x256xf32> to vector<8x256xf32>
    %26 = vector.shape_cast %23 : vector<8x256xf32> to vector<1x8x256xf32>
    tpu.vector_store %arg6[%c0_14, %c0_15, %c0_16], %26 {strides = array<i32>} : memref<1x8x256xf32, #tpu.memory_space<vmem>>, vector<1x8x256xf32>,
    return
  }
  func.func @transform_0(%arg0: i32, %arg1: i32) -> (i32, i32, i32) {
    %c0_i32 = arith.constant 0 : i32
    %c0_i32_0 = arith.constant 0 : i32
    return %arg0, %c0_i32, %arg1 : i32, i32, i32
  }
  func.func @transform_1(%arg0: i32, %arg1: i32) -> (i32, i32, i32) {
    %c0_i32 = arith.constant 0 : i32
    %c0_i32_0 = arith.constant 0 : i32
    %c0_i32_1 = arith.constant 0 : i32
    %c0_i32_2 = arith.constant 0 : i32
    return %c0_i32, %c0_i32_0, %c0_i32_1 : i32, i32, i32
  }
  func.func @transform_2(%arg0: i32, %arg1: i32) -> (i32, i32) {
    %c0_i32 = arith.constant 0 : i32
    %c0_i32_0 = arith.constant 0 : i32
    %c0_i32_1 = arith.constant 0 : i32
    return %c0_i32, %c0_i32_0 : i32, i32
  }
  func.func @transform_3(%arg0: i32, %arg1: i32) -> (i32, i32) {
    %c0_i32 = arith.constant 0 : i32
    %c0_i32_0 = arith.constant 0 : i32
    %c0_i32_1 = arith.constant 0 : i32
    return %c0_i32, %c0_i32_0 : i32, i32
  }
  func.func @transform_4(%arg0: i32, %arg1: i32) -> (i32, i32, i32) {
    %c0_i32 = arith.constant 0 : i32
    %c0_i32_0 = arith.constant 0 : i32
    return %arg0, %c0_i32, %arg1 : i32, i32, i32
  }
}

</mosaic_0001>

<bundles_post_ra>
// kernel: tpu_custom_call.1
= control target key start
LH: loop header
LB: loop body
LE: loop exit
PB: predicated region body
PF: predicated region fallthrough
CT: control target
= control target key end

     0   :  { %9 = vsyncpa [#allocation3], 0  ;;  %s730_s0 = inlined_call_operand.vmem [shape: f32[2,4,256], index: 0, kind: input, shape index: {}]   ;;  %s731_s1 = inlined_call_operand.vmem [shape: f32[2,4,1], index: 1, kind: input, shape index: {}]   ;;  %s732_s2 = inlined_call_operand.vmem [shape: bf16[8,4], index: 2, kind: input, shape index: {}]   ;;  %s733_s3 = inlined_call_operand.vmem [shape: f32[8,1], index: 3, kind: input, shape index: {}]   ;;  %s734_s4 = inlined_call_operand.hbm [shape: f32[2,8,256], index: 4, kind: output, shape index: {}]  }
   0x1   :  { %11 = vsyncpa [#allocation3 + $0x1], 0  ;;  %s607_s15 = smov 0   ;;  %s609_s16 = smov 0  }
   0x2   :  { %s611_s17 = smov 0   ;;  %s613_s18 = smov 0  }
   0x3   :  { %s615_s19 = smov 0   ;;  %s617_s20 = smov 0  }
   0x4 LB: > { %s422_s21 = sadd.s32 4294967295, %s577_s20   ;;  %s423_s22 = sadd.s32 4294967294, %s577_s20   ;;  %s577_s20 = sphi %s617_s20, %s17_s20   ;;  %s573_s19 = sphi %s615_s19, %s741_s19   ;;  %s569_s18 = sphi %s613_s18, %s740_s18   ;;  %s565_s17 = sphi %s611_s17, %s739_s17   ;;  %s561_s16 = sphi %s609_s16, %s738_s16   ;;  %s557_s15 = sphi %s607_s15, %s737_s15  }
   0x5   : > { %s29_s23 = sadd.s32 1, %s573_s19  ;;  %s129_s24 = sadd.s32 1, %s565_s17 }
   0x6   : > { %p31_p0 = scmp.ge.s32.totalorder %s29_s23, 2  ;;  %p139_p1 = scmp.ne.s32.totalorder %s565_s17, %s561_s16 }
   0x7   : > { %p140_p2 = scmp.eq.s32.totalorder %s422_s21, 1  ;;  %p145_p3 = scmp.ne.s32.totalorder %s561_s16, %s557_s15 }
   0x8   : > { %s743_s23 = smov (%p31_p0, %s29_s23), 0  ;;  %p146_p5 = scmp.eq.s32.totalorder %s423_s22, 1 }
   0x9   : > { %p647_p4 = por %p140_p2, %p139_p1  ;;  %s124_s26 = ssub.s32 %s573_s19, %s743_s23 }
   0xa   : > { %p426_p6 = scmp.ge.s32.totalorder %s577_s20, 1  ;;  %p127_p7 = scmp.eq.s32.totalorder %s124_s26, 0 }
   0xb   : > { %p654_p8 = por %p146_p5, %p145_p3  ;;  %p186_p9 = scmp.lt.s32.totalorder %s577_s20, 3 }
   0xc   : > { %s660_s28 = scalar_select %p127_p7, %s565_s17, %s129_s24  }
   0xd   : > { %p187_p10 = pnand %p426_p6, %p186_p9 }
   0xe   : > { %p217_p11 = scmp.lt.s32.totalorder (!%p187_p10), %s569_s18, 1  ;;  %s213_s22 = sand.u32 (!%p187_p10), 1, %s561_s16  }
   0xf   : > { %190 = sbr.rel (%p187_p10) target bundleno = 393 (0x189), region = 36  ;;  %s427_s24 = sshll.u32 (!%p187_p10), %s213_s22, 4 }
  0x10   : > { %s439_s26 = sshll.u32 (!%p187_p10), %s569_s18, 8  ;;  %s215_s29 = scalar_lea.vmem (!%p187_p10), [#allocation2], %s427_s24 }
  0x11   : > { %s346_s30 = sshll.u32 (!%p187_p10), %s215_s29, 4  ;;  %s684_s7 = scalar_lea.hbm (!%p187_p10), %s734_s4, %s439_s26  ;;  %s686_s30 = int_to_ptr.vmem [resolvable:$true] %s346_s30 }
  0x12   : > { %s501_s8 = scalar_lea.vmem (!%p187_p10), %s686_s30, 256 }
  0x13   : > { %p502_p12 = scmp.ne.s32.totalorder (!%p187_p10), %s686_s30, %s501_s8 }
  0x14   : > { %v229_v0 = vld [vmem:[%s731_s1] sm:$0xf]  ;;  %v579_v1 = vmov 0   ;;  %v430_v2 = vld [vmem:[%s731_s1 + $0x4] sm:$0xf]  ;;  %v239_v6 = vlaneseq  ;;  %s218_s9 = scalar_select %p217_p11, %s569_s18, 1 }
  0x15   : > { %497 = vset.pattern.permute.xlu0 %v579_v1  ;;  %318 = vmatprep.mubr.bf16.mxu0 %v579_v1  ;;  %v269_v3 = vld [vmem:[%s733_s3] sm:$0xff]  ;;  %v580_v4 = vmov 839922192   ;;  %vm279_vm0 = vcmask 1041408   ;;  %vm275_vm1 = vcmask 31744   ;;  %s330_s18 = scalar_lea.sflag [#allocation3], %s213_s22  ;;  %p503_p13 = pnand %p502_p12, %p647_p4 }
  0x16   : > { %234 = vperm.xlu0 %497, %v229_v0   ;;  %498 = vset.pattern.permute.xlu1 %v579_v1  ;;  %v237_v5 = vunpack.c.l.s4 %v580_v4  ;;  %v240_v8 = vshrl.u32 %v239_v6, 7  ;;  %s438_s10 = sshll.u32 %s218_s9, 3  ;;  %v263_v26 = vld [vmem:[%s732_s2] sm:$0xf]  ;;  %s581_s9 = smov [#allocation2]  }
  0x17   : > { %272 = vperm.xlu1 %498, %v269_v3   ;;  %s224_s13 = scalar_lea.vmem %s730_s0, %s438_s10  ;;  %p504_p0 = pneg %p503_p13 }
  0x18   : > { %v238_v7 = vunpack.c.0.s8 %v237_v5  ;;  %v228_v12 = vld [vmem:[%s224_s13] sm:$0xff]  ;;  %s505_s10 = sshll.u32 %s581_s9, 4  ;;  %s506_s10 = int_to_ptr.vmem [resolvable:$false] %s505_s10 }
  0x19   : > { %s507_s11 = scalar_lea.vmem %s506_s10, 512  ;;  %p508_p1 = scmp.lt.s32.totalorder %s686_s30, %s506_s10 }
  0x1a   : > { %247 = vperm.xlu0 %497, %v430_v2   ;;  %v241_v9 = vsub.s32 %v238_v7, %v240_v8  ;;  %p509_p2 = scmp.lt.s32.totalorder %s507_s11, %s501_s8 }
  0x1c   : > { %p510_p3 = por %p509_p2, %p508_p1 }
  0x1e   : > { %p511_p5 = pnand %p510_p3, %p504_p0 }
  0x91   : > { %v235_v10 = vpop.permute.xlu0 %234 }
  0x92   : > { %v242_v11 = vrot.slane %v235_v10, %v241_v9  ;;  %v273_v27 = vpop.permute.xlu1 %272 }
  0x94   : > { %v244_v14 = vmul.f32 %v242_v11, %v228_v12 }
  0x95   : > { %v248_v13 = vpop.permute.xlu0 %247 }
  0x96   : > { %v255_v15 = vrot.slane %v248_v13, %v241_v9 }
  0x98   : > { %v257_v16 = vadd.f32 %v255_v15, %v244_v14 }
  0x9a   : > { %v259_v17 = vmul.f32 0.70710677, %v257_v16  ;;  %v258_v19 = vmul.f32 0.5, %v257_v16 }
  0x9c   : > { %499 = verf.f32 %v259_v17 }
  0xa9   : > { %v500_v18 = vpop.eup %499 }
  0xaa   : > { %v261_v20 = vadd.f32 1.0, %v500_v18 }
  0xac   : > { %v262_v21 = vmul.f32 %v261_v20, %v258_v19 }
  0xae   : > { %v265_v22 = vcombine.high %v262_v21, %v262_v21  ;;  %v267_v23 = vpack.c.bf16 %v262_v21, %v262_v21 }
  0xb0   : > { %v268_v24 = vpack.c.bf16 %v265_v22, %v265_v22  ;;  %v281_v25 = vsel %vm279_vm0, %v267_v23, 0 }
  0xb2   : > { %431 = vmatprep.subr.msk.bf16.mxu0 %vm279_vm0, %v268_v24 }
  0xb3   : > { %301 = vmatpush1.bf16.msra.mxu0 %v281_v25 }
  0xb6   : > { %432 = vmatmul.mubr.msk.bf16.vlgmr.msra.gmra.mxu0 %vm275_vm1, %v263_v26 }
 0x176   : > { %v320_v28 = vpop.f32.mrf.mxu0 }
 0x177   : > { %v321_v29 = vadd.f32 %v320_v28, %v273_v27 }
 0x178   : > { %v322_v30 = vpop.f32.mrf.mxu0 }
 0x179   : > { %327 = vst [vmem:[%s215_s29] sm:$0xff] %v321_v29  ;;  %v323_v31 = vadd.f32 %v322_v30, %v273_v27 }
 0x17a   : > { %v324_v32 = vpop.f32.mrf.mxu0 }
 0x17b   : > { %328 = vst [vmem:[%s215_s29 + $0x8] sm:$0xff] %v323_v31 }
 0x17c   : > { %v325_v33 = vpop.f32.mrf.mxu0 }
 0x17d   : > { %514 = shalt.err (!%p511_p5)
}
 0x17e   : > { %s515_s12 = scalar_lea.hbm %s684_s7, 256  ;;  %s519_s21 = scalar_lea.hbm %s734_s4, 512 }
 0x17f   : > { %p516_p6 = scmp.ne.s32.totalorder %s684_s7, %s515_s12  ;;  %p520_p10 = scmp.lt.s32.totalorder %s684_s7, %s734_s4 }
 0x180   : > { %p521_p11 = scmp.lt.s32.totalorder %s519_s21, %s515_s12 }
 0x181   : > { %p517_p7 = pnand %p516_p6, %p647_p4 }
 0x182   : > { %p522_p12 = por %p521_p11, %p520_p10 }
 0x183   : > { %p518_p9 = pneg %p517_p7 }
 0x185   : > { %p523_p13 = pnand %p522_p12, %p518_p9 }
 0x187   : > { %526 = shalt.err (!%p523_p13)
}
 0x188   : > { %440 = dma.vmem_to_hbm [thread:$0]  (%p647_p4), %s686_s30, 256, %s684_s7, %s330_s18  }
 0x189 PF: > { %p446_p0 = scmp.ge.s32.totalorder %s577_s20, 2  ;;  %s358_s26 = sand.u32 1, %s557_s15  }
 0x18a   : > { %s359_s29 = scalar_lea.sflag [#allocation3], %s358_s26 }
 0x18b   : > { %p443_p1 = pnand %p446_p0, %p654_p8 }
 0x18d   : > { %p444_p2 = pneg %p443_p1 }
 0x18f   : > { %552 = dma.done.wait (%p444_p2), %s359_s29, 256  }
 0x190   : > { %554 = vsyncadd (%p444_p2), %s359_s29, 4294967040  ;;  %s17_s20 = sadd.s32 1, %s577_s20   ;;  %s737_s15 = smov %s561_s16 }
 0x191   : > { %p14_p3 = scmp.ge.s32.totalorder %s17_s20, 4   ;;  %s738_s16 = smov %s565_s17 }
 0x192   : > { %s739_s17 = smov %s660_s28  ;;  %s740_s18 = smov %s573_s19 }
 0x193   : > { %s741_s19 = smov %s743_s23  ;;  %16 = sbr.rel (!%p14_p3) target bundleno = 4 (0x4), region = 72 }
 0x198   :  { %364 = vsyncpa [#allocation3], 1 }
 0x199   :  { %366 = vsyncpa [#allocation3 + $0x1], 1 }

</bundles_post_ra>
